<compile_context>
chip_gen: v7x
topology: tpu7x:2x2x1
jax: 0.10.0
libtpu: 0.0.40
codegen_flags: <defaults>
</compile_context>

<pallas_src>
import jax
import jax.numpy as jnp
from jax.experimental import pallas as pl
from jax.experimental.pallas import tpu as pltpu


def _attention_kernel(q_ref, v_ref, ctx_ref, attn_ref):
    # q_ref   : (tq, H)  native dtype
    # v_ref   : (S,  H)  native dtype (same block for every q-tile of a batch)
    # ctx_ref : (tq, H)  context output
    # attn_ref: (tq, S)  attention-weights output (lane-dense full-row store)
    q = q_ref[...]
    v = v_ref[...]

    # score tile (tq, S): contract over H; no explicit V transpose.
    s = jax.lax.dot_general(
        q, v,
        dimension_numbers=(((1,), (1,)), ((), ())),
        preferred_element_type=jnp.float32,
    )

    # Numerically-stable softmax over the full S row, all in f32.
    m = jnp.max(s, axis=-1, keepdims=True)
    p = jnp.exp(s - m)
    l = jnp.sum(p, axis=-1, keepdims=True)
    inv_l = pl.reciprocal(l, approx=False)   # exact: attn is a returned output
    attn = p * inv_l

    attn_ref[...] = attn.astype(attn_ref.dtype)

    # context (tq, H) = attn @ v, contracting over the full S on the MXU.
    ctx_ref[...] = jax.lax.dot_general(
        attn.astype(v.dtype), v,
        dimension_numbers=(((1,), (0,)), ((), ())),
        preferred_element_type=jnp.float32,
    ).astype(ctx_ref.dtype)


def _estimate_vmem_bytes(tq: int, S: int, H: int, itemsize: int) -> int:
    # Double-buffered I/O blocks + f32 intermediates (scores / probs / attn / ctx).
    io_blocks = 2 * itemsize * (tq * H + S * H + tq * H + tq * S)
    f32_tmp = 4 * (3 * tq * S + tq * H)
    return io_blocks + f32_tmp


def _choose_q_tile(Q: int, S: int, H: int, itemsize: int, budget: int) -> int:
    """Largest q-tile that divides Q, is a multiple of 8 (or == Q), and keeps
    the estimated VMEM footprint under `budget`."""
    if Q <= 8 or _estimate_vmem_bytes(Q, S, H, itemsize) <= budget:
        return Q
    t = min(Q, 512)
    t -= t % 8
    while t >= 8:
        if Q % t == 0 and _estimate_vmem_bytes(t, S, H, itemsize) <= budget:
            return t
        t -= 8
    # Nothing under budget: smallest legal multiple-of-8 divisor (rely on the
    # raised scoped-VMEM limit).
    t = 8
    while t <= Q:
        if Q % t == 0:
            return t
        t += 8
    return Q


@jax.jit
def dot_product_attention(query: jax.Array, value: jax.Array):
    """query: (B, Q, H), value: (B, S, H) -> (context (B, Q, H), attn (B, Q, S))."""
    B, Q, H = query.shape
    Bv, S, Hv = value.shape
    assert B == Bv and H == Hv, "query/value batch or hidden dims mismatch"

    itemsize = jnp.dtype(query.dtype).itemsize
    budget = 24 * 1024 * 1024
    tq = _choose_q_tile(Q, S, H, itemsize, budget)
    n_q = Q // tq

    est = _estimate_vmem_bytes(tq, S, H, itemsize)
    vmem_limit = int(min(56 * 1024 * 1024, max(32 * 1024 * 1024, 2 * est)))

    context, attn = pl.pallas_call(
        _attention_kernel,
        out_shape=(
            jax.ShapeDtypeStruct((B, Q, H), query.dtype),
            jax.ShapeDtypeStruct((B, Q, S), query.dtype),
        ),
        grid=(B, n_q),
        in_specs=[
            pl.BlockSpec((pl.Squeezed(), tq, H), lambda b, qi: (b, qi, 0)),
            # Constant block index across qi -> the pipeline skips re-fetching V.
            pl.BlockSpec((pl.Squeezed(), S, H), lambda b, qi: (b, 0, 0)),
        ],
        out_specs=(
            pl.BlockSpec((pl.Squeezed(), tq, H), lambda b, qi: (b, qi, 0)),
            pl.BlockSpec((pl.Squeezed(), tq, S), lambda b, qi: (b, qi, 0)),
        ),
        compiler_params=pltpu.CompilerParams(
            dimension_semantics=("parallel", "parallel"),
            vmem_limit_bytes=vmem_limit,
        ),
    )(query, value)
    return context, attn


def _reference(query, value):
    hi = jax.lax.Precision.HIGHEST
    score = jnp.einsum("bqh,bsh->bqs", query, value, precision=hi)
    attn = jax.nn.softmax(score, axis=-1)
    context = jnp.einsum("bqs,bsh->bqh", attn, value, precision=hi)
    return context, attn


if __name__ == "__main__":
    key = jax.random.PRNGKey(0)
    kq, kv = jax.random.split(key)

    B, Q, S, H = 2, 8, 16, 32
    query = jax.random.normal(kq, (B, Q, H), dtype=jnp.float32)
    value = jax.random.normal(kv, (B, S, H), dtype=jnp.float32)

    context, attn = dot_product_attention(query, value)
    jax.block_until_ready((context, attn))

    ctx_ref, attn_ref = _reference(query, value)
    assert jnp.allclose(attn, attn_ref, atol=1e-4, rtol=1e-4), "attn mismatch"
    assert jnp.allclose(context, ctx_ref, atol=1e-4, rtol=1e-4), "context mismatch"

    print("KERNEL_OK")
</pallas_src>

<mosaic_0001>
module attributes {stable_mosaic.version = 11 : i64} {
  func.func @_attention_kernel(%arg0: i32, %arg1: i32, %arg2: memref<1x8x32xf32, #tpu.memory_space<vmem>>, %arg3: memref<1x16x32xf32, #tpu.memory_space<vmem>>, %arg4: memref<1x8x32xf32, #tpu.memory_space<vmem>>, %arg5: memref<1x8x16xf32, #tpu.memory_space<vmem>>) attributes {dimension_semantics = [#tpu.dimension_semantics<parallel>, #tpu.dimension_semantics<parallel>], iteration_bounds = array<i64: 2, 1>, scalar_prefetch = 0 : i64, scratch_operands = 0 : i64, tpu.core_type = #tpu.core_type<tc>, window_params = [{transform_indices = @transform_0, window_bounds = array<i64: 1, 8, 32>}, {transform_indices = @transform_1, window_bounds = array<i64: 1, 16, 32>}, {transform_indices = @transform_2, window_bounds = array<i64: 1, 8, 32>}, {transform_indices = @transform_3, window_bounds = array<i64: 1, 8, 16>}]} {
    %c0 = arith.constant 0 : index
    %c0_0 = arith.constant 0 : index
    %c0_1 = arith.constant 0 : index
    %0 = vector.load %arg2[%c0, %c0_0, %c0_1] : memref<1x8x32xf32, #tpu.memory_space<vmem>>, vector<1x8x32xf32>
    %1 = vector.shape_cast %0 : vector<1x8x32xf32> to vector<8x32xf32>
    %c0_2 = arith.constant 0 : index
    %c0_3 = arith.constant 0 : index
    %c0_4 = arith.constant 0 : index
    %2 = vector.load %arg3[%c0_2, %c0_3, %c0_4] : memref<1x16x32xf32, #tpu.memory_space<vmem>>, vector<1x16x32xf32>
    %3 = vector.shape_cast %2 : vector<1x16x32xf32> to vector<16x32xf32>
    %cst = arith.constant dense<0.000000e+00> : vector<8x16xf32>
    %4 = tpu.matmul %1, %3, %cst {dimension_numbers = #tpu.dot_dimension_numbers<[1], [1], [0], [0], [0, 0, 1, 0], [], []>} : vector<8x32xf32>, vector<16x32xf32>, vector<8x16xf32> -> vector<8x16xf32>
    %cst_5 = arith.constant dense<0xFF800000> : vector<8xf32>
    %5 = vector.multi_reduction <maximumf>, %4, %cst_5 [1] : vector<8x16xf32> to vector<8xf32>
    %6 = vector.shape_cast %5 : vector<8xf32> to vector<8x1xf32>
    %7 = vector.broadcast %6 : vector<8x1xf32> to vector<8x16xf32>
    %8 = arith.subf %4, %7 : vector<8x16xf32>
    %9 = math.exp %8 : vector<8x16xf32>
    %cst_6 = arith.constant dense<0.000000e+00> : vector<8xf32>
    %10 = vector.multi_reduction <add>, %9, %cst_6 [1] : vector<8x16xf32> to vector<8xf32>
    %11 = vector.shape_cast %10 : vector<8xf32> to vector<8x1xf32>
    %12 = tpu.reciprocal %11 : vector<8x1xf32> -> vector<8x1xf32>
    %13 = vector.broadcast %12 : vector<8x1xf32> to vector<8x16xf32>
    %14 = arith.mulf %9, %13 : vector<8x16xf32>
    %c0_7 = arith.constant 0 : index
    %c0_8 = arith.constant 0 : index
    %c0_9 = arith.constant 0 : index
    %15 = vector.load %arg5[%c0_7, %c0_8, %c0_9] : memref<1x8x16xf32, #tpu.memory_space<vmem>>, vector<1x8x16xf32>
    %16 = vector.shape_cast %15 : vector<1x8x16xf32> to vector<8x16xf32>
    %17 = vector.shape_cast %14 : vector<8x16xf32> to vector<1x8x16xf32>
    tpu.vector_store %arg5[%c0_7, %c0_8, %c0_9], %17 {strides = array<i32>} : memref<1x8x16xf32, #tpu.memory_space<vmem>>, vector<1x8x16xf32>,
    %cst_10 = arith.constant dense<0.000000e+00> : vector<8x32xf32>
    %18 = tpu.matmul %14, %3, %cst_10 {dimension_numbers = #tpu.dot_dimension_numbers<[1], [0], [0], [1], [0, 0, 1, 1], [], []>} : vector<8x16xf32>, vector<16x32xf32>, vector<8x32xf32> -> vector<8x32xf32>
    %c0_11 = arith.constant 0 : index
    %c0_12 = arith.constant 0 : index
    %c0_13 = arith.constant 0 : index
    %19 = vector.load %arg4[%c0_11, %c0_12, %c0_13] : memref<1x8x32xf32, #tpu.memory_space<vmem>>, vector<1x8x32xf32>
    %20 = vector.shape_cast %19 : vector<1x8x32xf32> to vector<8x32xf32>
    %21 = vector.shape_cast %18 : vector<8x32xf32> to vector<1x8x32xf32>
    tpu.vector_store %arg4[%c0_11, %c0_12, %c0_13], %21 {strides = array<i32>} : memref<1x8x32xf32, #tpu.memory_space<vmem>>, vector<1x8x32xf32>,
    return
  }
  func.func @transform_0(%arg0: i32, %arg1: i32) -> (i32, i32, i32) {
    %c0_i32 = arith.constant 0 : i32
    %c0_i32_0 = arith.constant 0 : i32
    return %arg0, %arg1, %c0_i32 : i32, i32, i32
  }
  func.func @transform_1(%arg0: i32, %arg1: i32) -> (i32, i32, i32) {
    %c0_i32 = arith.constant 0 : i32
    %c0_i32_0 = arith.constant 0 : i32
    %c0_i32_1 = arith.constant 0 : i32
    return %arg0, %c0_i32, %c0_i32_0 : i32, i32, i32
  }
  func.func @transform_2(%arg0: i32, %arg1: i32) -> (i32, i32, i32) {
    %c0_i32 = arith.constant 0 : i32
    %c0_i32_0 = arith.constant 0 : i32
    return %arg0, %arg1, %c0_i32 : i32, i32, i32
  }
  func.func @transform_3(%arg0: i32, %arg1: i32) -> (i32, i32, i32) {
    %c0_i32 = arith.constant 0 : i32
    %c0_i32_0 = arith.constant 0 : i32
    return %arg0, %arg1, %c0_i32 : i32, i32, i32
  }
}

</mosaic_0001>

<bundles_post_ra>
// kernel: dot_product_attention.1
= control target key start
LH: loop header
LB: loop body
LE: loop exit
PB: predicated region body
PF: predicated region fallthrough
CT: control target
= control target key end

     0   :  { %9 = vsyncpa [#allocation3], 0  ;;  %s1201_s0 = inlined_call_operand.hbm [shape: f32[2,8,32], index: 0, kind: input, shape index: {}]   ;;  %s1202_s1 = inlined_call_operand.hbm [shape: f32[2,16,32], index: 1, kind: input, shape index: {}]   ;;  %s1203_s2 = inlined_call_operand.hbm [shape: f32[2,8,32], index: 2, kind: output, shape index: {0}]   ;;  %s1204_s3 = inlined_call_operand.hbm [shape: f32[2,8,16], index: 3, kind: output, shape index: {1}]  }
   0x1   :  { %11 = vsyncpa [#allocation3 + $0x1], 0 }
   0x2   :  { %12 = vsyncpa [#allocation6], 0 }
   0x3   :  { %14 = vsyncpa [#allocation6 + $0x1], 0 }
   0x4   :  { %15 = vsyncpa [#allocation4], 0 }
   0x5   :  { %17 = vsyncpa [#allocation4 + $0x1], 0 }
   0x6   :  { %18 = vsyncpa [#allocation9], 0 }
   0x7   :  { %20 = vsyncpa [#allocation9 + $0x1], 0  ;;  %s938_s12 = smov 0   ;;  %s940_s13 = smov 0  }
   0x8   :  { %s942_s14 = smov 0   ;;  %s944_s15 = smov 0  }
   0x9   :  { %s946_s16 = smov 0   ;;  %s948_s17 = smov 0  }
   0xa LB: > { %s596_s18 = sadd.s32 4294967295, %s907_s17   ;;  %s597_s19 = sadd.s32 4294967294, %s907_s17   ;;  %s907_s17 = sphi %s948_s17, %s26_s17   ;;  %s903_s16 = sphi %s946_s16, %s1223_s16   ;;  %s899_s15 = sphi %s944_s15, %s1222_s15   ;;  %s895_s14 = sphi %s942_s14, %s1221_s14   ;;  %s891_s13 = sphi %s940_s13, %s1220_s13   ;;  %s887_s12 = sphi %s938_s12, %s1219_s12  }
   0xb   : > { %s38_s20 = sadd.s32 1, %s903_s16  ;;  %s47_s21 = sadd.s32 1, %s895_s14 }
   0xc   : > { %p40_p0 = scmp.ge.s32.totalorder %s38_s20, 2  ;;  %p54_p1 = scmp.ne.s32.totalorder %s895_s14, %s891_s13 }
   0xd   : > { %p55_p2 = scmp.eq.s32.totalorder %s907_s17, 0  ;;  %p60_p3 = scmp.ne.s32.totalorder %s891_s13, %s887_s12 }
   0xe   : > { %s1225_s20 = smov (%p40_p0, %s38_s20), 0  ;;  %p61_p5 = scmp.eq.s32.totalorder %s596_s18, 0 }
   0xf   : > { %p979_p4 = por %p55_p2, %p54_p1  ;;  %s42_s23 = ssub.s32 %s903_s16, %s1225_s20 }
  0x10   : > { %p112_p6 = scmp.eq.s32.totalorder %s596_s18, 1  ;;  %p45_p7 = scmp.eq.s32.totalorder %s42_s23, 0 }
  0x11   : > { %p985_p8 = por %p61_p5, %p60_p3  ;;  %p118_p10 = scmp.eq.s32.totalorder %s597_s19, 1 }
  0x12   : > { %p989_p9 = por %p112_p6, %p54_p1  ;;  %p670_p13 = scmp.lt.s32.totalorder %s907_s17, 2 }
  0x13   : > { %s1208_s24 = scalar_select %p985_p8, 1, 0 }
  0x14   : > { %s1209_s25 = scalar_select %p989_p9, 1, 0 }
  0x15   : > { %s994_s26 = scalar_select %p45_p7, %s895_s14, %s47_s21  }
  0x16   : > { %p996_p11 = por %p118_p10, %p60_p3  ;;  %s1003_s28 = sand.u32 1, %s895_s14  }
  0x17   : > { %s600_s29 = sshll.u32 %s1003_s28, 3  ;;  %s601_s30 = sshll.u32 %s903_s16, 7 }
  0x18   : > { %s1210_s27 = scalar_select %p996_p11, 1, 0 }
  0x19   : > { %s1010_s6 = scalar_lea.hbm %s1201_s0, %s601_s30  ;;  %s170_s7 = scalar_lea.vmem [#allocation2], %s600_s29 }
  0x1a   : > { %s178_s8 = sshll.u32 %s170_s7, 4  ;;  %p1016_p0 = pnand %p670_p13, %p979_p4  ;;  %s1012_s8 = int_to_ptr.vmem [resolvable:$true] %s178_s8 }
  0x1b   : > { %s167_s10 = scalar_lea.sflag [#allocation3], %s1003_s28  ;;  %s729_s11 = scalar_lea.hbm %s1010_s6, 128 }
  0x1c   : > { %p730_p3 = scmp.ne.s32.totalorder %s1010_s6, %s729_s11  ;;  %p731_p5 = pneg %p1016_p0 }
  0x1d   : > { %s734_s21 = scalar_lea.hbm %s1201_s0, 256  ;;  %p735_p4 = scmp.lt.u32.totalorder %s1010_s6, %s1201_s0 }
  0x1e   : > { %p732_p6 = pnand %p731_p5, %p730_p3  ;;  %p736_p10 = scmp.lt.u32.totalorder %s734_s21, %s729_s11 }
  0x1f   : > { %p738_p12 = scmp.lt.u32.totalorder %s729_s11, %s1010_s6 }
  0x20   : > { %p733_p7 = pneg %p732_p6  ;;  %p737_p13 = por %p736_p10, %p735_p4 }
  0x22   : > { %p739_p1 = por %p738_p12, %p737_p13 }
  0x24   : > { %p740_p2 = pnand %p739_p1, %p733_p7 }
  0x26   : > { %743 = shalt.err (!%p740_p2)
}
  0x27   : > { %s744_s29 = scalar_lea.vmem %s1012_s8, 128  ;;  %s909_s30 = smov [#allocation2]  }
  0x28   : > { %p745_p3 = scmp.ne.s32.totalorder %s1012_s8, %s744_s29  ;;  %s749_s4 = sshll.u32 %s909_s30, 4  ;;  %s750_s4 = int_to_ptr.vmem [resolvable:$false] %s749_s4 }
  0x29   : > { %s751_s5 = scalar_lea.vmem %s750_s4, 256  ;;  %p752_p9 = scmp.lt.s32.totalorder %s1012_s8, %s750_s4 }
  0x2a   : > { %p747_p6 = pnand %p745_p3, %p731_p5  ;;  %p753_p4 = scmp.lt.s32.totalorder %s751_s5, %s744_s29 }
  0x2c   : > { %p748_p11 = pneg %p747_p6  ;;  %p754_p10 = por %p753_p4, %p752_p9 }
  0x2e   : > { %p755_p12 = pnand %p754_p10, %p748_p11 }
  0x30   : > { %758 = shalt.err (!%p755_p12)
}
  0x31   : > { %659 = dma.hbm_to_vmem [thread:$0]  (!%p1016_p0), %s1010_s6, 128, %s1012_s8, %s167_s10  }
  0x32   : > { %p1212_p1 = scmp.lt.s32.totalorder %s907_s17, 3  ;;  %p1213_p2 = scmp.ge.s32.totalorder %s907_s17, 1 }
  0x33   : > { %s602_s11 = sshll.u32 %s1003_s28, 4  ;;  %s620_s18 = sshll.u32 %s903_s16, 8 }
  0x34   : > { %p1052_p7 = pnand %p1213_p2, %p1212_p1  ;;  %s1061_s22 = scalar_lea.hbm %s1202_s1, %s620_s18 }
  0x35   : > { %s189_s23 = scalar_lea.vmem [#allocation5], %s602_s11  ;;  %s186_s6 = scalar_lea.sflag [#allocation6], %s1003_s28 }
  0x36   : > { %s196_s29 = sshll.u32 %s189_s23, 4  ;;  %s759_s8 = scalar_lea.hbm %s1061_s22, 256  ;;  %s1063_s29 = int_to_ptr.vmem [resolvable:$true] %s196_s29 }
  0x37   : > { %p760_p9 = scmp.ne.s32.totalorder %s1061_s22, %s759_s8  ;;  %s764_s4 = scalar_lea.hbm %s1202_s1, 512 }
  0x38   : > { %p765_p3 = scmp.lt.u32.totalorder %s1061_s22, %s1202_s1  ;;  %p766_p6 = scmp.lt.u32.totalorder %s764_s4, %s759_s8 }
  0x39   : > { %p762_p11 = pnand %p760_p9, %p731_p5  ;;  %p768_p10 = scmp.lt.u32.totalorder %s759_s8, %s1061_s22 }
  0x3a   : > { %p767_p4 = por %p766_p6, %p765_p3 }
  0x3b   : > { %p763_p13 = pneg %p762_p11 }
  0x3c   : > { %p769_p12 = por %p768_p10, %p767_p4 }
  0x3e   : > { %p770_p1 = pnand %p769_p12, %p763_p13 }
  0x40   : > { %773 = shalt.err (!%p770_p1)
}
  0x41   : > { %s774_s11 = scalar_lea.vmem %s1063_s29, 256  ;;  %s910_s19 = smov [#allocation5]  }
  0x42   : > { %p775_p2 = scmp.ne.s32.totalorder %s1063_s29, %s774_s11  ;;  %s779_s21 = sshll.u32 %s910_s19, 4  ;;  %s780_s21 = int_to_ptr.vmem [resolvable:$false] %s779_s21 }
  0x43   : > { %s781_s23 = scalar_lea.vmem %s780_s21, 512  ;;  %p782_p8 = scmp.lt.s32.totalorder %s1063_s29, %s780_s21 }
  0x44   : > { %p777_p9 = pnand %p775_p2, %p731_p5  ;;  %p783_p3 = scmp.lt.s32.totalorder %s781_s23, %s774_s11 }
  0x46   : > { %p778_p11 = pneg %p777_p9  ;;  %p784_p6 = por %p783_p3, %p782_p8 }
  0x48   : > { %p785_p4 = pnand %p784_p6, %p778_p11 }
  0x4a   : > { %788 = shalt.err (!%p785_p4)
}
  0x4b   : > { %s911_s8 = smov 128   ;;  %s912_s10 = smov 8  }
  0x4c   : > { %662 = dma.hbm_to_vmem [thread:$0]  (!%p1016_p0), %s1061_s22, 256, %s1063_s29, %s186_s6, %s911_s8, %s911_s8, %s912_s10  }
  0x4d   : > { %208 = sbr.rel (%p1052_p7) target bundleno = 851 (0x353), region = 28  ;;  %s1094_s30 = sand.u32 (!%p1052_p7), 1, %s891_s13  }
  0x4e   : > { %s1097_s4 = sshll.u32 (!%p1052_p7), %s1094_s30, 3  ;;  %s211_s5 = scalar_lea.sflag (!%p1052_p7), [#allocation3], %s1094_s30 }
  0x4f   : > { %s214_s18 = scalar_lea.vmem (!%p1052_p7), [#allocation2], %s1097_s4  ;;  %p1215_p8 = scmp.ne.s32.totalorder (!%p1052_p7), %s1208_s24, 0 }
  0x54   : > { %870 = dma.done.wait (%p1215_p8), %s211_s5, 128  }
  0x55   : > { %872 = vsyncadd (%p1215_p8), %s211_s5, 4294967168  ;;  %s607_s28 = sshll.u32 %s1094_s30, 4  ;;  %s220_s9 = scalar_lea.sflag [#allocation6], %s1094_s30 }
  0x56   : > { %s223_s7 = scalar_lea.vmem [#allocation5], %s607_s28 }
  0x57   : > { %874 = dma.done.wait (%p1215_p8), %s220_s9, 256  }
  0x58   : > { %876 = vsyncadd (%p1215_p8), %s220_s9, 4294967040  ;;  %v913_v0 = vmov 0.0|0.0   ;;  %vm914_vm0 = vmmov 0   ;;  %v915_v1 = vmov 0.0   ;;  %vm259_vm1 = vcmask 261120   ;;  %v257_v2 = vld [vmem:[%s223_s7] sm:$0xff] }
  0x59   : > { %641 = vmatprep.subr.bf16.mxu0 %v913_v0  ;;  %631 = vmatprep.mubr.msk.f32.mxu0 %vm914_vm0, %v915_v1  ;;  %v258_v3 = vld [vmem:[%s223_s7 + $0x8] sm:$0xff]  ;;  %vm643_vm2 = vmpackc.low %vm259_vm1, %vm259_vm1  ;;  %vm339_vm3 = vcmask 130048   ;;  %s255_s24 = scalar_lea.vmem [#allocation8], %s1097_s4  ;;  %s616_s22 = sshll.u32 %s899_s15, 7 }
  0x5a   : > { %645 = vmatprep.subr.bf16.mxu1 %v913_v0  ;;  %638 = vmatprep.mubr.msk.f32.mxu1 %vm914_vm0, %v915_v1  ;;  %v642_v4 = vpack.c.bf16 %v258_v3, %v257_v2  ;;  %v256_v5 = vld [vmem:[%s214_s18] sm:$0xff]  ;;  %s1125_s11 = scalar_lea.hbm %s1204_s3, %s616_s22  ;;  %s460_s19 = sshll.u32 %s255_s24, 4  ;;  %s461_s19 = int_to_ptr.vmem [resolvable:$true] %s460_s19 }
  0x5b   : > { %s432_s21 = scalar_lea.sflag [#allocation9], %s1094_s30  ;;  %s789_s23 = scalar_lea.vmem %s461_s19, 128 }
  0x5c   : > { %644 = vmatpush3.bf16.xpose.msk.msra.mxu0 %vm643_vm2, %v642_v4  ;;  %647 = vmatpush3.bf16.msra.mxu1 %v642_v4  ;;  %p790_p0 = scmp.ne.s32.totalorder %s461_s19, %s789_s23  ;;  %p1216_p5 = scmp.ne.s32.totalorder %s1209_s25, 0 }
  0x5d   : > { %s916_s8 = smov [#allocation8]  }
  0x5e   : > { %p791_p7 = pnand %p790_p0, %p1216_p5  ;;  %s793_s10 = sshll.u32 %s916_s8, 4  ;;  %s794_s10 = int_to_ptr.vmem [resolvable:$false] %s793_s10 }
  0x5f   : > { %s795_s5 = scalar_lea.vmem %s794_s10, 256  ;;  %p796_p10 = scmp.lt.s32.totalorder %s461_s19, %s794_s10 }
  0x60   : > { %p792_p13 = pneg %p791_p7  ;;  %p797_p12 = scmp.lt.s32.totalorder %s795_s5, %s789_s23 }
  0x62   : > { %p798_p1 = por %p797_p12, %p796_p10 }
  0x63   : > { %632 = vmatmul.mubr.msk.f32.vlgmr.msra.gmra.mrb[0].mxu0 %vm259_vm1, %v256_v5 }
  0x64   : > { %p799_p2 = pnand %p798_p1, %p792_p13 }
 0x136   : > { %v335_v6 = vpop.f32.mrb[0].mxu0 }
 0x137   : > { %v633_v7 = vpop.f32.mrb[1].mxu0  ;;  %v340_v8 = vsel %vm339_vm3, %v335_v6, -inf }
 0x138   : > { %341 = vmax.xlane.f32.xlu0 %v340_v8 }
 0x1c5   : > { %v342_v9 = vpop.xlane.xlu0 %341 }
 0x1c6   : > { %v343_v10 = vsub.f32 %v335_v6, %v342_v9 }
 0x1c8   : > { %v344_v11 = vmul.f32 1.442695, %v343_v10 }
 0x1ca   : > { %725 = vpow2.f32 %v344_v11 }
 0x1d4   : > { %v726_v12 = vpop.eup %725 }
 0x1d5   : > { %v346_v13 = vsel %vm339_vm3, %v726_v12, 0.0 }
 0x1d6   : > { %347 = vadd.xlane.f32.xlu0 %v346_v13 }
 0x263   : > { %v348_v14 = vpop.xlane.xlu0 %347 }
 0x264   : > { %727 = vrcp.f32 %v348_v14 }
 0x26e   : > { %v728_v15 = vpop.eup %727 }
 0x26f   : > { %v350_v16 = vmul.f32 %v728_v15, %v726_v12 }
 0x271   : > { %639 = vmatmul.mubr.msk.f32.vlgmr.msra.gmra.mrb[0].mxu1 %vm339_vm3, %v350_v16  ;;  %351 = vst.msk [vmem:[%s255_s24] sm:$0xff] %vm339_vm3, %v350_v16 }
 0x272   : > { %802 = shalt.err (!%p799_p2)
}
 0x273   : > { %s803_s18 = scalar_lea.hbm %s1125_s11, 128  ;;  %s807_s7 = scalar_lea.hbm %s1204_s3, 256 }
 0x274   : > { %p804_p9 = scmp.ne.s32.totalorder %s1125_s11, %s803_s18  ;;  %p808_p6 = scmp.lt.u32.totalorder %s1125_s11, %s1204_s3 }
 0x275   : > { %p809_p4 = scmp.lt.u32.totalorder %s807_s7, %s803_s18  ;;  %p811_p0 = scmp.lt.u32.totalorder %s803_s18, %s1125_s11 }
 0x276   : > { %p805_p11 = pnand %p804_p9, %p1216_p5 }
 0x277   : > { %p810_p8 = por %p809_p4, %p808_p6 }
 0x278   : > { %p806_p3 = pneg %p805_p11 }
 0x279   : > { %p812_p7 = por %p811_p0, %p810_p8 }
 0x27b   : > { %p813_p13 = pnand %p812_p7, %p806_p3 }
 0x27d   : > { %816 = shalt.err (!%p813_p13)
}
 0x27e   : > { %653 = dma.vmem_to_hbm [thread:$0]  (%p1216_p5), %s461_s19, 128, %s1125_s11, %s432_s21  }
 0x27f   : > { %s248_s6 = scalar_lea.vmem [#allocation7], %s1097_s4  ;;  %s1151_s5 = scalar_lea.hbm %s1203_s2, %s616_s22 }
 0x280   : > { %s446_s23 = sshll.u32 %s248_s6, 4  ;;  %s427_s18 = scalar_lea.sflag [#allocation4], %s1094_s30  ;;  %s1153_s23 = int_to_ptr.vmem [resolvable:$true] %s446_s23 }
 0x281   : > { %s817_s28 = scalar_lea.vmem %s1153_s23, 128  ;;  %s917_s15 = smov [#allocation7]  }
 0x282   : > { %p818_p10 = scmp.ne.s32.totalorder %s1153_s23, %s817_s28  ;;  %s821_s4 = sshll.u32 %s917_s15, 4  ;;  %s822_s4 = int_to_ptr.vmem [resolvable:$false] %s821_s4 }
 0x283   : > { %s823_s22 = scalar_lea.vmem %s822_s4, 256  ;;  %p824_p2 = scmp.lt.s32.totalorder %s1153_s23, %s822_s4 }
 0x284   : > { %p819_p12 = pnand %p818_p10, %p1216_p5  ;;  %p825_p9 = scmp.lt.s32.totalorder %s823_s22, %s817_s28 }
 0x286   : > { %p820_p1 = pneg %p819_p12  ;;  %p826_p11 = por %p825_p9, %p824_p2 }
 0x288   : > { %p827_p3 = pnand %p826_p11, %p820_p1 }
 0x344   : > { %v421_v17 = vpop.f32.mrb[0].mxu1 }
 0x345   : > { %425 = vst.msk [vmem:[%s248_s6] sm:$0xff] %vm259_vm1, %v421_v17  ;;  %v640_v18 = vpop.f32.mrb[1].mxu1 }
 0x346   : > { %830 = shalt.err (!%p827_p3)
}
 0x347   : > { %s831_s30 = scalar_lea.hbm %s1151_s5, 128  ;;  %s835_s21 = scalar_lea.hbm %s1203_s2, 256 }
 0x348   : > { %p832_p6 = scmp.ne.s32.totalorder %s1151_s5, %s831_s30  ;;  %p836_p0 = scmp.lt.u32.totalorder %s1151_s5, %s1203_s2 }
 0x349   : > { %p837_p7 = scmp.lt.u32.totalorder %s835_s21, %s831_s30  ;;  %p839_p10 = scmp.lt.u32.totalorder %s831_s30, %s1151_s5 }
 0x34a   : > { %p833_p4 = pnand %p832_p6, %p1216_p5 }
 0x34b   : > { %p838_p13 = por %p837_p7, %p836_p0 }
 0x34c   : > { %p834_p8 = pneg %p833_p4 }
 0x34d   : > { %p840_p12 = por %p839_p10, %p838_p13 }
 0x34f   : > { %p841_p1 = pnand %p840_p12, %p834_p8 }
 0x351   : > { %844 = shalt.err (!%p841_p1)
}
 0x352   : > { %652 = dma.vmem_to_hbm [thread:$0]  (%p1216_p5), %s1153_s23, 128, %s1151_s5, %s427_s18  }
 0x353 PF: > { %s472_s24 = sand.u32 1, %s887_s12   ;;  %p1217_p2 = scmp.ne.s32.totalorder %s1210_s27, 0 }
 0x354   : > { %p1218_p9 = scmp.ge.s32.totalorder %s907_s17, 2  ;;  %s473_s29 = scalar_lea.sflag [#allocation4], %s472_s24 }
 0x356   : > { %p664_p11 = pnand %p1218_p9, %p1217_p2 }
 0x358   : > { %878 = dma.done.wait (!%p664_p11), %s473_s29, 128  }
 0x359   : > { %880 = vsyncadd (!%p664_p11), %s473_s29, 4294967168  ;;  %s482_s6 = scalar_lea.sflag [#allocation9], %s472_s24 }
 0x35a   : > { %882 = dma.done.wait (!%p664_p11), %s482_s6, 128  }
 0x35b   : > { %884 = vsyncadd (!%p664_p11), %s482_s6, 4294967168  ;;  %s26_s17 = sadd.s32 1, %s907_s17   ;;  %s1219_s12 = smov %s891_s13 }
 0x35c   : > { %p23_p3 = scmp.ge.s32.totalorder %s26_s17, 4   ;;  %s1220_s13 = smov %s895_s14 }
 0x35d   : > { %s1221_s14 = smov %s994_s26  ;;  %s1222_s15 = smov %s903_s16 }
 0x35e   : > { %s1223_s16 = smov %s1225_s20  ;;  %25 = sbr.rel (!%p23_p3) target bundleno = 10 (0xa), region = 103 }
 0x365   :  { %487 = vsyncpa [#allocation3], 1 }
 0x366   :  { %489 = vsyncpa [#allocation3 + $0x1], 1 }
 0x367   :  { %490 = vsyncpa [#allocation6], 1 }
 0x368   :  { %492 = vsyncpa [#allocation6 + $0x1], 1 }
 0x369   :  { %493 = vsyncpa [#allocation4], 1 }
 0x36a   :  { %495 = vsyncpa [#allocation4 + $0x1], 1 }
 0x36b   :  { %496 = vsyncpa [#allocation9], 1 }
 0x36c   :  { %498 = vsyncpa [#allocation9 + $0x1], 1 }

</bundles_post_ra>
